<compile_context>
chip_gen: v7x
topology: tpu7x:2x2x1
jax: 0.10.0
libtpu: 0.0.40
codegen_flags: <defaults>
</compile_context>

<pallas_src>
import functools

import jax
import jax.numpy as jnp
from jax.experimental import pallas as pl
from jax.experimental.pallas import tpu as pltpu


# ---------------------------------------------------------------------------
# helpers
# ---------------------------------------------------------------------------

def _round_up(n, m):
    return pl.cdiv(n, m) * m


def _pad2(x, rows, cols, dtype):
    r, c = x.shape
    return jnp.pad(x, ((0, rows - r), (0, cols - c))).astype(dtype)


def _vmem_capacity_bytes():
    try:
        return int(pltpu.get_tpu_info().vmem_capacity_bytes)
    except Exception:
        return 64 * 1024 * 1024          # conservative fallback (v7x per-core)


def _vmem_limit_bytes():
    # ~80% of physical VMEM: ~102 MiB on 128 MiB v5e/v6e, ~51 MiB on 64 MiB v7x.
    return max(32 * 1024 * 1024, int(_vmem_capacity_bytes() * 0.8))


def _choose_tiles(n128, hp, cp, budget, tm_target=1024, tk_target=1024):
    """Row (tm) / contraction (tk) tiles: each 128*2^k, tm | tk, budget-bound."""
    def fits(tm, tk):
        use = (2 * tm * tk * 2                      # A tile, bf16, double-buffered
               + 2 * tk * hp * 2                    # XW1/HW2 tile, bf16, dbl-buf
               + 2 * tm * max(hp, cp) * 4           # output tile, dbl-buf
               + tm * max(hp, cp) * 4               # f32 accumulator scratch
               + 2 * (hp * cp * 2 + (hp + cp) * 4)) # resident weights / biases
        return use <= budget
    tm = 128
    while tm * 2 <= min(tm_target, n128) and fits(tm * 2, tm * 2):
        tm *= 2
    tk = tm
    while tk * 2 <= min(tk_target, n128) and fits(tm, tk * 2):
        tk *= 2
    return tm, tk


def _masked_log_softmax(z, num_labels):
    """log_softmax over the first num_labels lanes; padded lanes are masked out
    of the max / denominator (their output is garbage and sliced off later)."""
    col = jax.lax.broadcasted_iota(jnp.int32, z.shape, 1)
    valid = col < num_labels
    m = jnp.max(jnp.where(valid, z, -jnp.inf), axis=1, keepdims=True)
    e = jnp.where(valid, jnp.exp(z - m), 0.0)
    lse = jnp.log(jnp.sum(e, axis=1, keepdims=True))
    return z - m - lse


# ---------------------------------------------------------------------------
# kernels
# ---------------------------------------------------------------------------

def _fused_kernel(a_ref, x_ref, w1_ref, b1_ref, w2_ref, b2_ref, o_ref, *,
                  num_labels):
    """Whole forward with A_hat VMEM-resident (A read from HBM exactly once)."""
    xw1 = jnp.dot(x_ref[...], w1_ref[...], preferred_element_type=jnp.float32)
    h = jnp.dot(a_ref[...], xw1.astype(a_ref.dtype),
                preferred_element_type=jnp.float32)
    h = jnp.maximum(h + b1_ref[...], 0.0)
    hw2 = jnp.dot(h.astype(w2_ref.dtype), w2_ref[...],
                  preferred_element_type=jnp.float32)
    z = jnp.dot(a_ref[...], hw2.astype(a_ref.dtype),
                preferred_element_type=jnp.float32) + b2_ref[...]
    o_ref[...] = _masked_log_softmax(z, num_labels)


def _transform_kernel(x_ref, w_ref, y_ref):
    """y_tile = x_tile @ W1   (bf16 in, f32 accumulate, bf16 store)."""
    y = jnp.dot(x_ref[...], w_ref[...], preferred_element_type=jnp.float32)
    y_ref[...] = y.astype(y_ref.dtype)


def _agg1_kernel(a_ref, xw_ref, b1_ref, w2_ref, y_ref, acc_ref):
    """K-tiled: acc += A_tile @ XW1_tile; finalize relu(acc+b1) @ W2."""
    k = pl.program_id(1)

    @pl.when(k == 0)
    def _():
        acc_ref[...] = jnp.zeros_like(acc_ref)

    acc_ref[...] += jnp.dot(a_ref[...], xw_ref[...],
                            preferred_element_type=jnp.float32)

    @pl.when(k == pl.num_programs(1) - 1)
    def _():
        h = jnp.maximum(acc_ref[...] + b1_ref[...], 0.0)
        y = jnp.dot(h.astype(w2_ref.dtype), w2_ref[...],
                    preferred_element_type=jnp.float32)
        y_ref[...] = y.astype(y_ref.dtype)


def _agg2_kernel(a_ref, hw_ref, b2_ref, o_ref, acc_ref, *, num_labels):
    """K-tiled: acc += A_tile @ HW2_tile; finalize masked log_softmax."""
    k = pl.program_id(1)

    @pl.when(k == 0)
    def _():
        acc_ref[...] = jnp.zeros_like(acc_ref)

    acc_ref[...] += jnp.dot(a_ref[...], hw_ref[...],
                            preferred_element_type=jnp.float32)

    @pl.when(k == pl.num_programs(1) - 1)
    def _():
        o_ref[...] = _masked_log_softmax(acc_ref[...] + b2_ref[...], num_labels)


# ---------------------------------------------------------------------------
# adjacency preprocessing (glue)
# ---------------------------------------------------------------------------

def build_normalized_adjacency(edges, num_nodes, pad_to=None, dtype=jnp.float32):
    """Dense A_hat = D^-1/2 (A + I) D^-1/2 from edge_index [2, E], built directly
    at the padded size and target dtype (one fused XLA pass, no extra pad+cast).
    Padded rows/cols are all-zero, so they contribute nothing downstream."""
    # TODO(synk): GCNConv's sparse scatter-add message passing is done here as
    # dense preprocessing; repeated edges are deduplicated (set, not add).
    size = int(num_nodes if pad_to is None else pad_to)
    a = jnp.zeros((size, size), jnp.float32)
    a = a.at[edges[0], edges[1]].set(1.0)
    a = a.at[edges[1], edges[0]].set(1.0)                       # undirected
    self_loop = (jnp.arange(size) < num_nodes).astype(jnp.float32)
    a = jnp.maximum(a, jnp.diag(self_loop))                     # self-loops (real nodes)
    deg = jnp.sum(a, axis=1)
    d_inv_sqrt = jnp.where(deg > 0, jax.lax.rsqrt(deg), 0.0)
    return (d_inv_sqrt[:, None] * a * d_inv_sqrt[None, :]).astype(dtype)


# ---------------------------------------------------------------------------
# forward wrapper (matches MacroGCN.forward(features, edges))
# ---------------------------------------------------------------------------

def macro_gcn_forward(features, edges, w1, b1, w2, b2, *, force_streamed=False):
    n, f = features.shape
    h = w1.shape[1]
    c = w2.shape[1]

    fp = _round_up(f, 128)            # lane-dense feature dim
    hp = _round_up(h, 128)            # lane-dense hidden dim
    cp = _round_up(c, 128)            # lane-dense label dim

    limit = _vmem_limit_bytes()

    # ---- fused fast path: A_hat VMEM-resident, single kernel ----------------
    n128 = _round_up(n, 128)
    fused_vmem = (n128 * n128 * 2                 # A bf16
                  + n128 * fp * 2                 # X bf16
                  + fp * hp * 2 + hp * cp * 2     # W1, W2 bf16
                  + (hp + cp) * 4                 # biases f32
                  + n128 * cp * 4                 # output f32
                  + 6 * n128 * max(hp, cp) * 4)   # intermediate headroom
    if not force_streamed and fused_vmem <= int(limit * 0.85):
        np_ = n128
        a_p = build_normalized_adjacency(edges, n, pad_to=np_, dtype=jnp.bfloat16)
        x_p = _pad2(features, np_, fp, jnp.bfloat16)
        w1_p = _pad2(w1, fp, hp, jnp.bfloat16)
        w2_p = _pad2(w2, hp, cp, jnp.bfloat16)
        b1_p = _pad2(b1.reshape(1, -1), 1, hp, jnp.float32)
        b2_p = _pad2(b2.reshape(1, -1), 1, cp, jnp.float32)

        out = pl.pallas_call(
            functools.partial(_fused_kernel, num_labels=c),
            out_shape=jax.ShapeDtypeStruct((np_, cp), jnp.float32),
            compiler_params=pltpu.CompilerParams(vmem_limit_bytes=limit),
        )(a_p, x_p, w1_p, b1_p, w2_p, b2_p)
        return out[:n, :c]

    # ---- streamed path: (rows, K) tiling, VMEM bounded independent of N -----
    tm, tk = _choose_tiles(n128, hp, cp, int(limit * 0.85))
    np_ = _round_up(n, max(tm, tk))   # tm | tk (powers-of-2 x 128) -> both divide np_
    row_grid = np_ // tm
    k_grid = np_ // tk

    a_p = build_normalized_adjacency(edges, n, pad_to=np_, dtype=jnp.bfloat16)
    x_p = _pad2(features, np_, fp, jnp.bfloat16)
    w1_p = _pad2(w1, fp, hp, jnp.bfloat16)
    w2_p = _pad2(w2, hp, cp, jnp.bfloat16)
    b1_p = _pad2(b1.reshape(1, -1), 1, hp, jnp.float32)
    b2_p = _pad2(b2.reshape(1, -1), 1, cp, jnp.float32)

    params_rows = pltpu.CompilerParams(
        dimension_semantics=("parallel",), vmem_limit_bytes=limit)
    params_rows_k = pltpu.CompilerParams(
        dimension_semantics=("parallel", "arbitrary"), vmem_limit_bytes=limit)

    # 1) feature transform: xw1 = X @ W1  (row-tiled, lane-dense in/out)
    xw1 = pl.pallas_call(
        _transform_kernel,
        out_shape=jax.ShapeDtypeStruct((np_, hp), jnp.bfloat16),
        grid=(row_grid,),
        in_specs=[
            pl.BlockSpec((tm, fp), lambda i: (i, 0)),
            pl.BlockSpec((fp, hp), lambda i: (0, 0)),
        ],
        out_specs=pl.BlockSpec((tm, hp), lambda i: (i, 0)),
        compiler_params=params_rows,
    )(x_p, w1_p)

    # 2) layer-1 aggregation (K-tiled A stream) + fused layer-2 transform
    hw2 = pl.pallas_call(
        _agg1_kernel,
        out_shape=jax.ShapeDtypeStruct((np_, cp), jnp.bfloat16),
        grid=(row_grid, k_grid),
        in_specs=[
            pl.BlockSpec((tm, tk), lambda i, k: (i, k)),   # A tile (streamed)
            pl.BlockSpec((tk, hp), lambda i, k: (k, 0)),   # XW1 K-tile
            pl.BlockSpec((1, hp), lambda i, k: (0, 0)),
            pl.BlockSpec((hp, cp), lambda i, k: (0, 0)),
        ],
        out_specs=pl.BlockSpec((tm, cp), lambda i, k: (i, 0)),
        scratch_shapes=[pltpu.VMEM((tm, hp), jnp.float32)],
        compiler_params=params_rows_k,
        cost_estimate=pl.CostEstimate(
            flops=int(2 * np_ * np_ * hp + 2 * np_ * hp * cp),
            transcendentals=0,
            bytes_accessed=int(np_ * np_ * 2 + row_grid * np_ * hp * 2
                               + np_ * cp * 2)),
    )(a_p, xw1, b1_p, w2_p)

    # 3) layer-2 aggregation (K-tiled A stream) + masked log_softmax
    out = pl.pallas_call(
        functools.partial(_agg2_kernel, num_labels=c),
        out_shape=jax.ShapeDtypeStruct((np_, cp), jnp.float32),
        grid=(row_grid, k_grid),
        in_specs=[
            pl.BlockSpec((tm, tk), lambda i, k: (i, k)),   # A tile (streamed)
            pl.BlockSpec((tk, cp), lambda i, k: (k, 0)),   # HW2 K-tile
            pl.BlockSpec((1, cp), lambda i, k: (0, 0)),
        ],
        out_specs=pl.BlockSpec((tm, cp), lambda i, k: (i, 0)),
        scratch_shapes=[pltpu.VMEM((tm, cp), jnp.float32)],
        compiler_params=params_rows_k,
        cost_estimate=pl.CostEstimate(
            flops=int(2 * np_ * np_ * cp),
            transcendentals=int(np_ * cp),
            bytes_accessed=int(np_ * np_ * 2 + row_grid * np_ * cp * 2
                               + np_ * cp * 4)),
    )(a_p, hw2, b2_p)

    return out[:n, :c]


# ---------------------------------------------------------------------------
# demo / correctness check
# ---------------------------------------------------------------------------

if __name__ == "__main__":
    # Small shapes implied by the module:
    #   number_of_features = 16, macro_gcn_dimensions (hidden) = 32,
    #   number_of_labels = 4, num_nodes = 8.
    num_nodes = 8
    num_features = 16
    hidden = 32
    num_labels = 4

    key = jax.random.PRNGKey(0)
    k_x, k_e, k_w1, k_b1, k_w2, k_b2 = jax.random.split(key, 6)

    features = jax.random.normal(k_x, (num_nodes, num_features), jnp.float32)

    # deterministic random edge list (edge_index, shape [2, E])
    num_edges = 16
    edges = jax.random.randint(k_e, (2, num_edges), 0, num_nodes, jnp.int32)

    # deterministic parameter init (GCNConv: weight (in, out), bias (out,))
    w1 = jax.random.normal(k_w1, (num_features, hidden), jnp.float32) * 0.1
    b1 = jax.random.normal(k_b1, (hidden,), jnp.float32) * 0.1
    w2 = jax.random.normal(k_w2, (hidden, num_labels), jnp.float32) * 0.1
    b2 = jax.random.normal(k_b2, (num_labels,), jnp.float32) * 0.1

    # Exercise both dispatch paths (fused resident-A fast path and the
    # K-tiled streamed path) so both compile and run on hardware.
    out_fused = macro_gcn_forward(features, edges, w1, b1, w2, b2)
    out_streamed = macro_gcn_forward(features, edges, w1, b1, w2, b2,
                                     force_streamed=True)
    jax.block_until_ready((out_fused, out_streamed))

    # f32 reference; kernels stream A/X/intermediates in bf16 -> relaxed tol.
    a_ref = build_normalized_adjacency(edges, num_nodes)     # f32, unpadded
    h1_ref = jnp.maximum(a_ref @ (features @ w1) + b1[None, :], 0.0)
    h2_ref = a_ref @ (h1_ref @ w2) + b2[None, :]
    ref = jax.nn.log_softmax(h2_ref, axis=1)

    for name, out in (("fused", out_fused), ("streamed", out_streamed)):
        err = float(jnp.max(jnp.abs(out - ref)))
        assert err < 5e-2, f"{name} mismatch vs reference: max abs err {err}"

    print("KERNEL_OK")
</pallas_src>

<mosaic_0001>
module attributes {stable_mosaic.version = 11 : i64} {
  func.func @_fused_kernel(%arg0: memref<128x128xbf16, #tpu.memory_space<vmem>>, %arg1: memref<128x128xbf16, #tpu.memory_space<vmem>>, %arg2: memref<128x128xbf16, #tpu.memory_space<vmem>>, %arg3: memref<1x128xf32, #tpu.memory_space<vmem>>, %arg4: memref<128x128xbf16, #tpu.memory_space<vmem>>, %arg5: memref<1x128xf32, #tpu.memory_space<vmem>>, %arg6: memref<128x128xf32, #tpu.memory_space<vmem>>) attributes {dimension_semantics = [], scalar_prefetch = 0 : i64, scratch_operands = 0 : i64, tpu.core_type = #tpu.core_type<tc>} {
    %c0 = arith.constant 0 : index
    %c0_0 = arith.constant 0 : index
    %0 = vector.load %arg1[%c0, %c0_0] : memref<128x128xbf16, #tpu.memory_space<vmem>>, vector<128x128xbf16>
    %c0_1 = arith.constant 0 : index
    %c0_2 = arith.constant 0 : index
    %1 = vector.load %arg2[%c0_1, %c0_2] : memref<128x128xbf16, #tpu.memory_space<vmem>>, vector<128x128xbf16>
    %cst = arith.constant dense<0.000000e+00> : vector<128x128xf32>
    %2 = tpu.matmul %0, %1, %cst {dimension_numbers = #tpu.dot_dimension_numbers<[1], [0], [0], [1], [0, 0, 1, 1], [], []>} : vector<128x128xbf16>, vector<128x128xbf16>, vector<128x128xf32> -> vector<128x128xf32>
    %c0_3 = arith.constant 0 : index
    %c0_4 = arith.constant 0 : index
    %3 = vector.load %arg0[%c0_3, %c0_4] : memref<128x128xbf16, #tpu.memory_space<vmem>>, vector<128x128xbf16>
    %4 = arith.truncf %2 : vector<128x128xf32> to vector<128x128xbf16>
    %cst_5 = arith.constant dense<0.000000e+00> : vector<128x128xf32>
    %5 = tpu.matmul %3, %4, %cst_5 {dimension_numbers = #tpu.dot_dimension_numbers<[1], [0], [0], [1], [0, 0, 1, 1], [], []>} : vector<128x128xbf16>, vector<128x128xbf16>, vector<128x128xf32> -> vector<128x128xf32>
    %c0_6 = arith.constant 0 : index
    %c0_7 = arith.constant 0 : index
    %6 = vector.load %arg3[%c0_6, %c0_7] : memref<1x128xf32, #tpu.memory_space<vmem>>, vector<1x128xf32>
    %7 = vector.broadcast %6 : vector<1x128xf32> to vector<128x128xf32>
    %8 = arith.addf %5, %7 : vector<128x128xf32>
    %cst_8 = arith.constant 0.000000e+00 : f32
    %9 = vector.broadcast %cst_8 : f32 to vector<128x128xf32>
    %10 = arith.maximumf %8, %9 : vector<128x128xf32>
    %11 = arith.truncf %10 : vector<128x128xf32> to vector<128x128xbf16>
    %c0_9 = arith.constant 0 : index
    %c0_10 = arith.constant 0 : index
    %12 = vector.load %arg4[%c0_9, %c0_10] : memref<128x128xbf16, #tpu.memory_space<vmem>>, vector<128x128xbf16>
    %cst_11 = arith.constant dense<0.000000e+00> : vector<128x128xf32>
    %13 = tpu.matmul %11, %12, %cst_11 {dimension_numbers = #tpu.dot_dimension_numbers<[1], [0], [0], [1], [0, 0, 1, 1], [], []>} : vector<128x128xbf16>, vector<128x128xbf16>, vector<128x128xf32> -> vector<128x128xf32>
    %c0_12 = arith.constant 0 : index
    %c0_13 = arith.constant 0 : index
    %14 = vector.load %arg0[%c0_12, %c0_13] : memref<128x128xbf16, #tpu.memory_space<vmem>>, vector<128x128xbf16>
    %15 = arith.truncf %13 : vector<128x128xf32> to vector<128x128xbf16>
    %cst_14 = arith.constant dense<0.000000e+00> : vector<128x128xf32>
    %16 = tpu.matmul %14, %15, %cst_14 {dimension_numbers = #tpu.dot_dimension_numbers<[1], [0], [0], [1], [0, 0, 1, 1], [], []>} : vector<128x128xbf16>, vector<128x128xbf16>, vector<128x128xf32> -> vector<128x128xf32>
    %c0_15 = arith.constant 0 : index
    %c0_16 = arith.constant 0 : index
    %17 = vector.load %arg5[%c0_15, %c0_16] : memref<1x128xf32, #tpu.memory_space<vmem>>, vector<1x128xf32>
    %18 = vector.broadcast %17 : vector<1x128xf32> to vector<128x128xf32>
    %19 = arith.addf %16, %18 : vector<128x128xf32>
    %20 = tpu.iota {dimensions = array<i32: 1>} : vector<128x128xi32>
    %c4_i32 = arith.constant 4 : i32
    %21 = vector.broadcast %c4_i32 : i32 to vector<128x128xi32>
    %22 = arith.cmpi slt, %20, %21 : vector<128x128xi32>
    %cst_17 = arith.constant 0xFF800000 : f32
    %23 = vector.broadcast %cst_17 : f32 to vector<128x128xf32>
    %24 = arith.select %22, %19, %23 : vector<128x128xi1>, vector<128x128xf32>
    %cst_18 = arith.constant dense<0xFF800000> : vector<128xf32>
    %25 = vector.multi_reduction <maximumf>, %24, %cst_18 [1] : vector<128x128xf32> to vector<128xf32>
    %26 = vector.shape_cast %25 : vector<128xf32> to vector<128x1xf32>
    %27 = vector.broadcast %26 : vector<128x1xf32> to vector<128x128xf32>
    %28 = arith.subf %19, %27 : vector<128x128xf32>
    %29 = math.exp %28 : vector<128x128xf32>
    %cst_19 = arith.constant 0.000000e+00 : f32
    %30 = vector.broadcast %cst_19 : f32 to vector<128x128xf32>
    %31 = arith.select %22, %29, %30 : vector<128x128xi1>, vector<128x128xf32>
    %cst_20 = arith.constant dense<0.000000e+00> : vector<128xf32>
    %32 = vector.multi_reduction <add>, %31, %cst_20 [1] : vector<128x128xf32> to vector<128xf32>
    %33 = vector.shape_cast %32 : vector<128xf32> to vector<128x1xf32>
    %34 = math.log %33 : vector<128x1xf32>
    %35 = vector.broadcast %26 : vector<128x1xf32> to vector<128x128xf32>
    %36 = arith.subf %19, %35 : vector<128x128xf32>
    %37 = vector.broadcast %34 : vector<128x1xf32> to vector<128x128xf32>
    %38 = arith.subf %36, %37 : vector<128x128xf32>
    %c0_21 = arith.constant 0 : index
    %c0_22 = arith.constant 0 : index
    %39 = vector.load %arg6[%c0_21, %c0_22] : memref<128x128xf32, #tpu.memory_space<vmem>>, vector<128x128xf32>
    tpu.vector_store %arg6[%c0_21, %c0_22], %38 {strides = array<i32>} : memref<128x128xf32, #tpu.memory_space<vmem>>, vector<128x128xf32>,
    return
  }
}

</mosaic_0001>

<bundles_post_ra>
// kernel: tpu_custom_call.1
= control target key start
LH: loop header
LB: loop body
LE: loop exit
PB: predicated region body
PF: predicated region fallthrough
CT: control target
= control target key end

     0   :  { %11 = vsyncpa [#allocation3], 0  ;;  %s1820_s0 = inlined_call_operand.hbm [shape: bf16[128,128], index: 0, kind: input, shape index: {}]   ;;  %s1821_s1 = inlined_call_operand.hbm [shape: bf16[128,128], index: 1, kind: input, shape index: {}]   ;;  %s1822_s2 = inlined_call_operand.hbm [shape: bf16[128,128], index: 2, kind: input, shape index: {}]   ;;  %s1823_s3 = inlined_call_operand.vmem [shape: f32[1,128], index: 3, kind: input, shape index: {}]   ;;  %s1824_s4 = inlined_call_operand.hbm [shape: bf16[128,128], index: 4, kind: input, shape index: {}]   ;;  %s1825_s5 = inlined_call_operand.vmem [shape: f32[1,128], index: 5, kind: input, shape index: {}]   ;;  %s1826_s6 = inlined_call_operand.hbm [shape: f32[128,128], index: 6, kind: output, shape index: {}]  }
   0x1   :  { %12 = vsyncpa [#allocation6], 0 }
   0x2   :  { %13 = vsyncpa [#allocation9], 0 }
   0x3   :  { %14 = vsyncpa [#allocation4], 0  ;;  %s1457_s21 = smov [#allocation5]   ;;  %s1458_s23 = smov [#allocation2]  }
   0x4   :  { %s32_s22 = sshll.u32 %s1457_s21, 4  ;;  %s20_s24 = sshll.u32 %s1458_s23, 4  ;;  %s33_s22 = int_to_ptr.vmem [resolvable:$true] %s32_s22  ;;  %s1501_s24 = int_to_ptr.vmem [resolvable:$true] %s20_s24 }
   0x5   :  { %s1339_s27 = scalar_lea.hbm %s1821_s1, 1024 }
   0x6   :  { %p1340_p0 = scmp.ne.s32.totalorder %s1821_s1, %s1339_s27  ;;  %p1343_p1 = scmp.lt.u32.totalorder %s1339_s27, %s1821_s1 }
   0x8   :  { %p1345_p2 = pnand %p1343_p1, %p1340_p0 }
   0xa   :  { %1348 = shalt.err (!%p1345_p2)
}
   0xb   :  { %s1349_s8 = scalar_lea.vmem %s33_s22, 1024  ;;  %p1354_p4 = scmp.lt.s32.totalorder %s33_s22, %s33_s22 }
   0xc   :  { %p1350_p3 = scmp.ne.s32.totalorder %s33_s22, %s1349_s8  ;;  %p1355_p5 = scmp.lt.s32.totalorder %s1349_s8, %s1349_s8 }
   0xe   :  { %p1356_p6 = por %p1355_p5, %p1354_p4 }
  0x10   :  { %p1357_p7 = pnand %p1356_p6, %p1350_p3 }
  0x12   :  { %1360 = shalt.err (!%p1357_p7)
}
  0x13   :  { %s1459_s9 = smov 64   ;;  %s1460_s10 = smov 4  }
  0x14   :  { %38 = dma.hbm_to_vmem [thread:$0]  %s1821_s1, 1024, %s33_s22, [#allocation6], %s1459_s9, %s1459_s9, %s1460_s10  }
  0x15   :  { %s1361_s15 = scalar_lea.hbm %s1820_s0, 1024 }
  0x16   :  { %p1362_p8 = scmp.ne.s32.totalorder %s1820_s0, %s1361_s15  ;;  %p1365_p9 = scmp.lt.u32.totalorder %s1361_s15, %s1820_s0 }
  0x18   :  { %p1367_p10 = pnand %p1365_p9, %p1362_p8 }
  0x1a   :  { %1370 = shalt.err (!%p1367_p10)
}
  0x1b   :  { %s1371_s20 = scalar_lea.vmem %s1501_s24, 1024  ;;  %p1376_p12 = scmp.lt.s32.totalorder %s1501_s24, %s1501_s24 }
  0x1c   :  { %p1372_p11 = scmp.ne.s32.totalorder %s1501_s24, %s1371_s20  ;;  %p1377_p13 = scmp.lt.s32.totalorder %s1371_s20, %s1371_s20 }
  0x1e   :  { %p1378_p0 = por %p1377_p13, %p1376_p12 }
  0x20   :  { %p1379_p1 = pnand %p1378_p0, %p1372_p11 }
  0x22   :  { %1382 = shalt.err (!%p1379_p1)
}
  0x23   :  { %26 = dma.hbm_to_vmem [thread:$0]  %s1820_s0, 1024, %s1501_s24, [#allocation3], %s1459_s9, %s1459_s9, %s1460_s10  }
  0x24   :  { %s1461_s22 = smov [#allocation7]   ;;  %s1462_s25 = smov [#allocation8]  }
  0x25   :  { %s44_s23 = sshll.u32 %s1461_s22, 4  ;;  %s58_s26 = sshll.u32 %s1462_s25, 4  ;;  %s45_s23 = int_to_ptr.vmem [resolvable:$true] %s44_s23  ;;  %s1538_s26 = int_to_ptr.vmem [resolvable:$true] %s58_s26 }
  0x26   :  { %s1383_s29 = scalar_lea.hbm %s1822_s2, 1024 }
  0x27   :  { %p1384_p2 = scmp.ne.s32.totalorder %s1822_s2, %s1383_s29  ;;  %p1387_p3 = scmp.lt.u32.totalorder %s1383_s29, %s1822_s2 }
  0x29   :  { %p1389_p4 = pnand %p1387_p3, %p1384_p2 }
  0x2b   :  { %1392 = shalt.err (!%p1389_p4)
}
  0x2c   :  { %s1393_s0 = scalar_lea.vmem %s45_s23, 1024  ;;  %p1398_p6 = scmp.lt.s32.totalorder %s45_s23, %s45_s23 }
  0x2d   :  { %p1394_p5 = scmp.ne.s32.totalorder %s45_s23, %s1393_s0  ;;  %p1399_p7 = scmp.lt.s32.totalorder %s1393_s0, %s1393_s0 }
  0x2f   :  { %p1400_p8 = por %p1399_p7, %p1398_p6 }
  0x31   :  { %p1401_p9 = pnand %p1400_p8, %p1394_p5 }
  0x33   :  { %1404 = shalt.err (!%p1401_p9)
}
  0x34   :  { %50 = dma.hbm_to_vmem [thread:$0]  %s1822_s2, 1024, %s45_s23, [#allocation6], %s1459_s9, %s1459_s9, %s1460_s10  }
  0x35   :  { %s1405_s15 = scalar_lea.hbm %s1824_s4, 1024 }
  0x36   :  { %p1406_p10 = scmp.ne.s32.totalorder %s1824_s4, %s1405_s15  ;;  %p1409_p11 = scmp.lt.u32.totalorder %s1405_s15, %s1824_s4 }
  0x38   :  { %p1411_p12 = pnand %p1409_p11, %p1406_p10 }
  0x3a   :  { %1414 = shalt.err (!%p1411_p12)
}
  0x3b   :  { %s1415_s20 = scalar_lea.vmem %s1538_s26, 1024  ;;  %p1420_p0 = scmp.lt.s32.totalorder %s1538_s26, %s1538_s26 }
  0x3c   :  { %p1416_p13 = scmp.ne.s32.totalorder %s1538_s26, %s1415_s20  ;;  %p1421_p1 = scmp.lt.s32.totalorder %s1415_s20, %s1415_s20 }
  0x3e   :  { %p1422_p2 = por %p1421_p1, %p1420_p0 }
  0x40   :  { %p1423_p3 = pnand %p1422_p2, %p1416_p13 }
  0x42   :  { %1426 = shalt.err (!%p1423_p3)
}
  0x43   :  { %64 = dma.hbm_to_vmem [thread:$0]  %s1824_s4, 1024, %s1538_s26, [#allocation9], %s1459_s9, %s1459_s9, %s1460_s10  }
  0x44   :  { %1449 = dma.done.wait [#allocation3], 1024  }
  0x45   :  { %1450 = vsyncadd [#allocation3], 4294966272 }
  0x46   :  { %1451 = dma.done.wait [#allocation6], 2048  }
  0x47   :  { %1452 = vsyncadd [#allocation6], 4294965248 }
  0x48   :  { %1453 = dma.done.wait [#allocation9], 1024  }
  0x49   :  { %1454 = vsyncadd [#allocation9], 4294966272  ;;  %v1243_v0 = vld [vmem:[#allocation7] sm:$0xff]   ;;  %v1244_v1 = vld [vmem:[#allocation7 + $0x8] sm:$0xff]  }
  0x4a   :  { %1106 = vmatprep.subr.bf16.mxu0 %v1243_v0  ;;  %v1245_v2 = vld [vmem:[#allocation7 + $0x10] sm:$0xff]   ;;  %v1246_v3 = vld [vmem:[#allocation7 + $0x18] sm:$0xff]   ;;  %v1251_v4 = vld [vmem:[#allocation5] sm:$0xff]  }
  0x4b   :  { %1107 = vmatpush3.bf16.msra.mxu0 %v1243_v0  ;;  %1122 = vmatprep.mubr.bf16.mxu0 %v1251_v4  ;;  %v1247_v5 = vld [vmem:[#allocation7 + $0x20] sm:$0xff]   ;;  %v1248_v6 = vld [vmem:[#allocation7 + $0x28] sm:$0xff]   ;;  %v1249_v7 = vld [vmem:[#allocation7 + $0x30] sm:$0xff]  }
  0x4c   :  { %1108 = vmatprep.subr.bf16.mxu0 %v1244_v1  ;;  %v1250_v8 = vld [vmem:[#allocation7 + $0x38] sm:$0xff]   ;;  %v1252_v9 = vld [vmem:[#allocation5 + $0x8] sm:$0xff]   ;;  %v1253_v10 = vld [vmem:[#allocation5 + $0x10] sm:$0xff]  }
  0x4d   :  { %v1254_v11 = vld [vmem:[#allocation5 + $0x18] sm:$0xff]   ;;  %v1255_v12 = vld [vmem:[#allocation5 + $0x20] sm:$0xff]   ;;  %v1256_v13 = vld [vmem:[#allocation5 + $0x28] sm:$0xff]  }
  0x4e   :  { %v1257_v14 = vld [vmem:[#allocation5 + $0x30] sm:$0xff]   ;;  %v1258_v15 = vld [vmem:[#allocation5 + $0x38] sm:$0xff]   ;;  %v1575_v16 = vld [vmem:[#allocation2] sm:$0xff]  }
  0x4f   :  { %1109 = vmatpush3.bf16.msra.mxu0 %v1244_v1  ;;  %1154 = vmatprep.mubr.bf16.mxu1 %v1575_v16  ;;  %v1267_v17 = vld [vmem:[#allocation8] sm:$0xff]   ;;  %v1268_v18 = vld [vmem:[#allocation8 + $0x8] sm:$0xff]   ;;  %v1269_v19 = vld [vmem:[#allocation8 + $0x10] sm:$0xff]  }
  0x50   :  { %1110 = vmatprep.subr.bf16.mxu0 %v1245_v2  ;;  %v1270_v20 = vld [vmem:[#allocation8 + $0x18] sm:$0xff]   ;;  %v1271_v21 = vld [vmem:[#allocation8 + $0x20] sm:$0xff]   ;;  %v1272_v22 = vld [vmem:[#allocation8 + $0x28] sm:$0xff]  }
  0x51   :  { %v1578_v47 = vld [vmem:[#allocation2 + $0x8] sm:$0xff]   ;;  %v1580_v48 = vld [vmem:[#allocation2 + $0x10] sm:$0xff]   ;;  %v1584_v49 = vld [vmem:[#allocation2 + $0x18] sm:$0xff]  }
  0x52   :  { %v1586_v50 = vld [vmem:[#allocation2 + $0x20] sm:$0xff]   ;;  %v1590_v51 = vld [vmem:[#allocation2 + $0x28] sm:$0xff]   ;;  %v1592_v52 = vld [vmem:[#allocation2 + $0x30] sm:$0xff]  }
  0x53   :  { %1111 = vmatpush3.bf16.msra.mxu0 %v1245_v2  ;;  %v1596_v53 = vld [vmem:[#allocation2 + $0x38] sm:$0xff]   ;;  %v1273_v54 = vld [vmem:[#allocation8 + $0x30] sm:$0xff]   ;;  %v1024_v56 = vld [vmem:[%s1823_s3] ss:$0 sm:$0xff] }
  0x54   :  { %1112 = vmatprep.subr.bf16.mxu0 %v1246_v3  ;;  %v1274_v55 = vld [vmem:[#allocation8 + $0x38] sm:$0xff]  }
  0x57   :  { %1113 = vmatpush3.bf16.msra.mxu0 %v1246_v3 }
  0x58   :  { %1114 = vmatprep.subr.bf16.mxu0 %v1247_v5 }
  0x5b   :  { %1115 = vmatpush3.bf16.msra.mxu0 %v1247_v5 }
  0x5c   :  { %1116 = vmatprep.subr.bf16.mxu0 %v1248_v6 }
  0x5f   :  { %1117 = vmatpush3.bf16.msra.mxu0 %v1248_v6 }
  0x60   :  { %1118 = vmatprep.subr.bf16.mxu0 %v1249_v7 }
  0x63   :  { %1119 = vmatpush3.bf16.msra.mxu0 %v1249_v7 }
  0x64   :  { %1120 = vmatprep.subr.bf16.mxu0 %v1250_v8 }
  0x67   :  { %1121 = vmatpush3.bf16.msra.mxu0 %v1250_v8 }
  0x68   :  { %1170 = vmatprep.subr.bf16.mxu0 %v1267_v17 }
  0x6a   :  { %1123 = vmatmul.mubr.bf16.vlgmr.msra.gmra.mrb[0].mxu0 %v1252_v9 }
  0x6b   :  { %1126 = vmatprep.mubr.bf16.mxu0 %v1253_v10  ;;  %1171 = vmatpush3.bf16.msra.mxu0 %v1267_v17 }
  0x6c   :  { %1172 = vmatprep.subr.bf16.mxu0 %v1268_v18 }
  0x6f   :  { %1173 = vmatpush3.bf16.msra.mxu0 %v1268_v18 }
  0x70   :  { %1174 = vmatprep.subr.bf16.mxu0 %v1269_v19 }
  0x72   :  { %1127 = vmatmul.mubr.bf16.gmra.mrb[4].mxu0 %v1254_v11 }
  0x73   :  { %1130 = vmatprep.mubr.bf16.mxu0 %v1255_v12  ;;  %1175 = vmatpush3.bf16.msra.mxu0 %v1269_v19 }
  0x74   :  { %1176 = vmatprep.subr.bf16.mxu0 %v1270_v20 }
  0x77   :  { %1177 = vmatpush3.bf16.msra.mxu0 %v1270_v20 }
  0x78   :  { %1178 = vmatprep.subr.bf16.mxu0 %v1271_v21 }
  0x7a   :  { %1131 = vmatmul.mubr.bf16.gmra.mrb[8].mxu0 %v1256_v13 }
  0x7b   :  { %1134 = vmatprep.mubr.bf16.mxu0 %v1257_v14  ;;  %1179 = vmatpush3.bf16.msra.mxu0 %v1271_v21 }
  0x7c   :  { %1180 = vmatprep.subr.bf16.mxu0 %v1272_v22 }
  0x7f   :  { %1181 = vmatpush3.bf16.msra.mxu0 %v1272_v22 }
  0x80   :  { %1182 = vmatprep.subr.bf16.mxu0 %v1273_v54 }
  0x82   :  { %1135 = vmatmul.mubr.bf16.gmra.mrb[12].mxu0 %v1258_v15 }
  0x83   :  { %1183 = vmatpush3.bf16.msra.mxu0 %v1273_v54 }
  0x84   :  { %1184 = vmatprep.subr.bf16.mxu0 %v1274_v55 }
  0x87   :  { %1185 = vmatpush3.bf16.msra.mxu0 %v1274_v55 }
 0x13d   :  { %v1124_v23 = vpop.f32.mrb[0].mxu0 }
 0x13e   :  { %v242_v24 = vpop.f32.mrb[1].mxu0 }
 0x13f   :  { %v1125_v25 = vpop.f32.mrb[2].mxu0 }
 0x140   :  { %v322_v26 = vpack.c.bf16 %v1125_v25, %v1124_v23  ;;  %v245_v27 = vpop.f32.mrb[3].mxu0 }
 0x141   :  { %v321_v28 = vpack.c.bf16 %v245_v27, %v242_v24 }
 0x143   :  { %1138 = vmatprep.subr.bf16.mxu1 %v321_v28 }
 0x144   :  { %1139 = vmatpush3.bf16.msra.mxu1 %v321_v28 }
 0x145   :  { %v1128_v29 = vpop.f32.mrb[4].mxu0  ;;  %1140 = vmatprep.subr.bf16.mxu1 %v322_v26 }
 0x146   :  { %v258_v30 = vpop.f32.mrb[5].mxu0 }
 0x147   :  { %v1129_v31 = vpop.f32.mrb[6].mxu0 }
 0x148   :  { %v324_v32 = vpack.c.bf16 %v1129_v31, %v1128_v29  ;;  %v261_v33 = vpop.f32.mrb[7].mxu0  ;;  %1141 = vmatpush3.bf16.msra.mxu1 %v322_v26 }
 0x149   :  { %v323_v34 = vpack.c.bf16 %v261_v33, %v258_v30 }
 0x14b   :  { %1142 = vmatprep.subr.bf16.mxu1 %v323_v34 }
 0x14c   :  { %1143 = vmatpush3.bf16.msra.mxu1 %v323_v34 }
 0x14d   :  { %v1132_v35 = vpop.f32.mrb[8].mxu0  ;;  %1144 = vmatprep.subr.bf16.mxu1 %v324_v32 }
 0x14e   :  { %v274_v36 = vpop.f32.mrb[9].mxu0 }
 0x14f   :  { %v1133_v37 = vpop.f32.mrb[10].mxu0 }
 0x150   :  { %v326_v38 = vpack.c.bf16 %v1133_v37, %v1132_v35  ;;  %v277_v39 = vpop.f32.mrb[11].mxu0  ;;  %1145 = vmatpush3.bf16.msra.mxu1 %v324_v32 }
 0x151   :  { %v325_v40 = vpack.c.bf16 %v277_v39, %v274_v36 }
 0x153   :  { %1146 = vmatprep.subr.bf16.mxu1 %v325_v40 }
 0x154   :  { %1147 = vmatpush3.bf16.msra.mxu1 %v325_v40 }
 0x155   :  { %v1136_v41 = vpop.f32.mrb[12].mxu0  ;;  %1148 = vmatprep.subr.bf16.mxu1 %v326_v38 }
 0x156   :  { %v290_v42 = vpop.f32.mrb[13].mxu0 }
 0x157   :  { %v1137_v43 = vpop.f32.mrb[14].mxu0 }
 0x158   :  { %v328_v44 = vpack.c.bf16 %v1137_v43, %v1136_v41  ;;  %v293_v45 = vpop.f32.mrb[15].mxu0  ;;  %1149 = vmatpush3.bf16.msra.mxu1 %v326_v38 }
 0x159   :  { %v327_v46 = vpack.c.bf16 %v293_v45, %v290_v42 }
 0x15b   :  { %1150 = vmatprep.subr.bf16.mxu1 %v327_v46 }
 0x15c   :  { %1151 = vmatpush3.bf16.msra.mxu1 %v327_v46 }
 0x15d   :  { %1152 = vmatprep.subr.bf16.mxu1 %v328_v44 }
 0x160   :  { %1153 = vmatpush3.bf16.msra.mxu1 %v328_v44 }
 0x163   :  { %1155 = vmatmul.mubr.bf16.vlgmr.msra.gmra.mrb[0].mxu1 %v1578_v47 }
 0x164   :  { %1158 = vmatprep.mubr.bf16.mxu1 %v1580_v48 }
 0x16b   :  { %1159 = vmatmul.mubr.bf16.gmra.mrb[4].mxu1 %v1584_v49 }
 0x16c   :  { %1162 = vmatprep.mubr.bf16.mxu1 %v1586_v50 }
 0x173   :  { %1163 = vmatmul.mubr.bf16.gmra.mrb[8].mxu1 %v1590_v51 }
 0x174   :  { %1166 = vmatprep.mubr.bf16.mxu1 %v1592_v52 }
 0x17b   :  { %1167 = vmatmul.mubr.bf16.gmra.mrb[12].mxu1 %v1596_v53 }
 0x17c   :  { %1218 = vmatprep.mubr.bf16.mxu1 %v1575_v16 }
 0x236   :  { %v1156_v57 = vpop.f32.mrb[0].mxu1 }
 0x237   :  { %v427_v58 = vadd.f32 %v1156_v57, %v1024_v56  ;;  %v418_v59 = vpop.f32.mrb[1].mxu1 }
 0x238   :  { %v419_v60 = vadd.f32 %v1024_v56, %v418_v59  ;;  %v1157_v61 = vpop.f32.mrb[2].mxu1 }
 0x239   :  { %v430_v62 = vadd.f32 %v1157_v61, %v1024_v56  ;;  %v421_v63 = vpop.f32.mrb[3].mxu1  ;;  %v483_v1 = vmax.f32 %v427_v58, 0.0 }
 0x23a   :  { %v422_v0 = vadd.f32 %v1024_v56, %v421_v63  ;;  %v481_v3 = vmax.f32 %v419_v60, 0.0 }
 0x23b   :  { %v484_v2 = vmax.f32 %v430_v62, 0.0 }
 0x23c   :  { %v482_v4 = vmax.f32 %v422_v0, 0.0 }
 0x23d   :  { %v498_v5 = vpack.c.bf16 %v484_v2, %v483_v1 }
 0x23e   :  { %v497_v6 = vpack.c.bf16 %v482_v4, %v481_v3  ;;  %v1160_v7 = vpop.f32.mrb[4].mxu1 }
 0x23f   :  { %v443_v8 = vadd.f32 %v1160_v7, %v1024_v56  ;;  %v434_v9 = vpop.f32.mrb[5].mxu1 }
 0x240   :  { %v435_v10 = vadd.f32 %v1024_v56, %v434_v9  ;;  %v1161_v11 = vpop.f32.mrb[6].mxu1  ;;  %1186 = vmatprep.mubr.bf16.mxu0 %v497_v6 }
 0x241   :  { %v446_v12 = vadd.f32 %v1161_v11, %v1024_v56  ;;  %v437_v13 = vpop.f32.mrb[7].mxu1  ;;  %1187 = vmatmul.mubr.bf16.vlgmr.msra.gmra.mrb[16].mxu0 %v498_v5  ;;  %v487_v15 = vmax.f32 %v443_v8, 0.0 }
 0x242   :  { %v438_v14 = vadd.f32 %v1024_v56, %v437_v13  ;;  %v485_v17 = vmax.f32 %v435_v10, 0.0 }
 0x243   :  { %v488_v16 = vmax.f32 %v446_v12, 0.0 }
 0x244   :  { %v486_v18 = vmax.f32 %v438_v14, 0.0 }
 0x245   :  { %v500_v19 = vpack.c.bf16 %v488_v16, %v487_v15  ;;  %v778_v16 = vlaneseq }
 0x246   :  { %v499_v20 = vpack.c.bf16 %v486_v18, %v485_v17  ;;  %v1164_v21 = vpop.f32.mrb[8].mxu1  ;;  %v1041_v18 = vld [vmem:[%s1825_s5] ss:$0 sm:$0xff]  ;;  %s1463_s5 = smov [#allocation10]  }
 0x247   :  { %v459_v22 = vadd.f32 %v1164_v21, %v1024_v56  ;;  %v450_v23 = vpop.f32.mrb[9].mxu1  ;;  %v1610_v17 = vand.u32 127, %v778_v16  ;;  %s994_s21 = sshll.u32 %s1463_s5, 4  ;;  %s995_s21 = int_to_ptr.vmem [resolvable:$true] %s994_s21 }
 0x248   :  { %v451_v24 = vadd.f32 %v1024_v56, %v450_v23  ;;  %v1165_v25 = vpop.f32.mrb[10].mxu1  ;;  %1190 = vmatprep.mubr.bf16.mxu0 %v499_v20  ;;  %s1427_s22 = scalar_lea.vmem %s995_s21, 2048  ;;  %p1432_p5 = scmp.lt.s32.totalorder %s995_s21, %s995_s21 }
 0x249   :  { %v462_v26 = vadd.f32 %v1165_v25, %v1024_v56  ;;  %v453_v27 = vpop.f32.mrb[11].mxu1  ;;  %1191 = vmatmul.mubr.bf16.gmra.mrb[20].mxu0 %v500_v19  ;;  %v491_v29 = vmax.f32 %v459_v22, 0.0  ;;  %vm780_vm0 = vcmp.lt.s32.totalorder %v1610_v17, 4  ;;  %p1428_p4 = scmp.ne.s32.totalorder %s995_s21, %s1427_s22  ;;  %p1433_p6 = scmp.lt.s32.totalorder %s1427_s22, %s1427_s22 }
 0x24a   :  { %v454_v28 = vadd.f32 %v1024_v56, %v453_v27  ;;  %v489_v31 = vmax.f32 %v451_v24, 0.0 }
 0x24b   :  { %v492_v30 = vmax.f32 %v462_v26, 0.0  ;;  %p1434_p7 = por %p1433_p6, %p1432_p5 }
 0x24c   :  { %v490_v32 = vmax.f32 %v454_v28, 0.0 }
 0x24d   :  { %v502_v33 = vpack.c.bf16 %v492_v30, %v491_v29  ;;  %p1435_p8 = pnand %p1434_p7, %p1428_p4 }
 0x24e   :  { %v501_v34 = vpack.c.bf16 %v490_v32, %v489_v31  ;;  %v1168_v35 = vpop.f32.mrb[12].mxu1 }
 0x24f   :  { %v475_v36 = vadd.f32 %v1168_v35, %v1024_v56  ;;  %v466_v37 = vpop.f32.mrb[13].mxu1 }
 0x250   :  { %v467_v38 = vadd.f32 %v1024_v56, %v466_v37  ;;  %v1169_v39 = vpop.f32.mrb[14].mxu1  ;;  %1194 = vmatprep.mubr.bf16.mxu0 %v501_v34 }
 0x251   :  { %v478_v40 = vadd.f32 %v1169_v39, %v1024_v56  ;;  %v469_v41 = vpop.f32.mrb[15].mxu1  ;;  %1195 = vmatmul.mubr.bf16.gmra.mrb[24].mxu0 %v502_v33  ;;  %v495_v43 = vmax.f32 %v475_v36, 0.0 }
 0x252   :  { %v470_v42 = vadd.f32 %v1024_v56, %v469_v41  ;;  %v493_v45 = vmax.f32 %v467_v38, 0.0 }
 0x253   :  { %v496_v44 = vmax.f32 %v478_v40, 0.0 }
 0x254   :  { %v494_v46 = vmax.f32 %v470_v42, 0.0 }
 0x255   :  { %v504_v54 = vpack.c.bf16 %v496_v44, %v495_v43 }
 0x256   :  { %v503_v55 = vpack.c.bf16 %v494_v46, %v493_v45 }
 0x258   :  { %1198 = vmatprep.mubr.bf16.mxu0 %v503_v55 }
 0x259   :  { %1199 = vmatmul.mubr.bf16.gmra.mrb[28].mxu0 %v504_v54 }
 0x314   :  { %v1188_v57 = vpop.f32.mrb[16].mxu0 }
 0x315   :  { %v603_v58 = vpop.f32.mrb[17].mxu0 }
 0x316   :  { %v1189_v59 = vpop.f32.mrb[18].mxu0 }
 0x317   :  { %v667_v60 = vpack.c.bf16 %v1189_v59, %v1188_v57  ;;  %v606_v61 = vpop.f32.mrb[19].mxu0 }
 0x318   :  { %v666_v62 = vpack.c.bf16 %v606_v61, %v603_v58 }
 0x31a   :  { %1202 = vmatprep.subr.bf16.mxu1 %v666_v62 }
 0x31b   :  { %1203 = vmatpush3.bf16.msra.mxu1 %v666_v62 }
 0x31c   :  { %v1192_v63 = vpop.f32.mrb[20].mxu0  ;;  %1204 = vmatprep.subr.bf16.mxu1 %v667_v60 }
 0x31d   :  { %v619_v0 = vpop.f32.mrb[21].mxu0 }
 0x31e   :  { %v1193_v56 = vpop.f32.mrb[22].mxu0 }
 0x31f   :  { %v669_v1 = vpack.c.bf16 %v1193_v56, %v1192_v63  ;;  %v622_v2 = vpop.f32.mrb[23].mxu0  ;;  %1205 = vmatpush3.bf16.msra.mxu1 %v667_v60 }
 0x320   :  { %v668_v3 = vpack.c.bf16 %v622_v2, %v619_v0 }
 0x322   :  { %1206 = vmatprep.subr.bf16.mxu1 %v668_v3 }
 0x323   :  { %1207 = vmatpush3.bf16.msra.mxu1 %v668_v3 }
 0x324   :  { %v1196_v4 = vpop.f32.mrb[24].mxu0  ;;  %1208 = vmatprep.subr.bf16.mxu1 %v669_v1 }
 0x325   :  { %v635_v5 = vpop.f32.mrb[25].mxu0 }
 0x326   :  { %v1197_v6 = vpop.f32.mrb[26].mxu0 }
 0x327   :  { %v671_v7 = vpack.c.bf16 %v1197_v6, %v1196_v4  ;;  %v638_v8 = vpop.f32.mrb[27].mxu0  ;;  %1209 = vmatpush3.bf16.msra.mxu1 %v669_v1 }
 0x328   :  { %v670_v9 = vpack.c.bf16 %v638_v8, %v635_v5 }
 0x32a   :  { %1210 = vmatprep.subr.bf16.mxu1 %v670_v9 }
 0x32b   :  { %1211 = vmatpush3.bf16.msra.mxu1 %v670_v9 }
 0x32c   :  { %v1200_v10 = vpop.f32.mrb[28].mxu0  ;;  %1212 = vmatprep.subr.bf16.mxu1 %v671_v7 }
 0x32d   :  { %v651_v11 = vpop.f32.mrb[29].mxu0 }
 0x32e   :  { %v1201_v12 = vpop.f32.mrb[30].mxu0 }
 0x32f   :  { %v673_v13 = vpack.c.bf16 %v1201_v12, %v1200_v10  ;;  %v654_v14 = vpop.f32.mrb[31].mxu0  ;;  %1213 = vmatpush3.bf16.msra.mxu1 %v671_v7 }
 0x330   :  { %v672_v15 = vpack.c.bf16 %v654_v14, %v651_v11 }
 0x332   :  { %1214 = vmatprep.subr.bf16.mxu1 %v672_v15 }
 0x333   :  { %1215 = vmatpush3.bf16.msra.mxu1 %v672_v15 }
 0x334   :  { %1216 = vmatprep.subr.bf16.mxu1 %v673_v13 }
 0x337   :  { %1217 = vmatpush3.bf16.msra.mxu1 %v673_v13 }
 0x33a   :  { %1219 = vmatmul.mubr.bf16.vlgmr.msra.gmra.mrb[16].mxu1 %v1578_v47 }
 0x33b   :  { %1222 = vmatprep.mubr.bf16.mxu1 %v1580_v48 }
 0x342   :  { %1223 = vmatmul.mubr.bf16.gmra.mrb[20].mxu1 %v1584_v49 }
 0x343   :  { %1226 = vmatprep.mubr.bf16.mxu1 %v1586_v50 }
 0x34a   :  { %1227 = vmatmul.mubr.bf16.gmra.mrb[24].mxu1 %v1590_v51 }
 0x34b   :  { %1230 = vmatprep.mubr.bf16.mxu1 %v1592_v52 }
 0x352   :  { %1231 = vmatmul.mubr.bf16.gmra.mrb[28].mxu1 %v1596_v53 }
 0x40d   :  { %v1220_v47 = vpop.f32.mrb[16].mxu1 }
 0x40e   :  { %v1616_v48 = vadd.f32 %v1220_v47, %v1041_v18  ;;  %v715_v49 = vpop.f32.mrb[17].mxu1 }
 0x40f   :  { %v1618_v50 = vadd.f32 %v1041_v18, %v715_v49  ;;  %v1221_v51 = vpop.f32.mrb[18].mxu1 }
 0x410   :  { %v1620_v19 = vadd.f32 %v1221_v51, %v1041_v18  ;;  %v718_v52 = vpop.f32.mrb[19].mxu1  ;;  %v783_v53 = vsel %vm780_vm0, %v1616_v48, -inf }
 0x411   :  { %v1625_v20 = vadd.f32 %v1041_v18, %v718_v52  ;;  %801 = vmax.xlane.f32.xlu1 %v783_v53  ;;  %v781_v21 = vsel %vm780_vm0, %v1618_v50, -inf }
 0x412   :  { %797 = vmax.xlane.f32.xlu0 %v781_v21  ;;  %v784_v22 = vsel %vm780_vm0, %v1620_v19, -inf }
 0x413   :  { %v782_v24 = vsel %vm780_vm0, %v1625_v20, -inf }
 0x415   :  { %803 = vmax.xlane.f32.xlu1 %v784_v22  ;;  %v1224_v23 = vpop.f32.mrb[20].mxu1 }
 0x416   :  { %v1636_v25 = vadd.f32 %v1224_v23, %v1041_v18  ;;  %v731_v26 = vpop.f32.mrb[21].mxu1  ;;  %799 = vmax.xlane.f32.xlu0 %v782_v24 }
 0x417   :  { %v1225_v27 = vpop.f32.mrb[22].mxu1  ;;  %v1643_v31 = vadd.f32 %v1041_v18, %v731_v26 }
 0x418   :  { %v1638_v28 = vadd.f32 %v1225_v27, %v1041_v18  ;;  %v734_v29 = vpop.f32.mrb[23].mxu1  ;;  %v787_v30 = vsel %vm780_vm0, %v1636_v25, -inf }
 0x419   :  { %v1645_v32 = vadd.f32 %v1041_v18, %v734_v29  ;;  %v785_v35 = vsel %vm780_vm0, %v1643_v31, -inf }
 0x41a   :  { %809 = vmax.xlane.f32.xlu0 %v787_v30  ;;  %v788_v33 = vsel %vm780_vm0, %v1638_v28, -inf }
 0x41b   :  { %811 = vmax.xlane.f32.xlu1 %v788_v33  ;;  %v786_v38 = vsel %vm780_vm0, %v1645_v32, -inf }
 0x41d   :  { %v1228_v34 = vpop.f32.mrb[24].mxu1 }
 0x41e   :  { %v1653_v36 = vadd.f32 %v1228_v34, %v1041_v18  ;;  %v747_v37 = vpop.f32.mrb[25].mxu1  ;;  %805 = vmax.xlane.f32.xlu0 %v785_v35 }
 0x41f   :  { %v1229_v39 = vpop.f32.mrb[26].mxu1  ;;  %807 = vmax.xlane.f32.xlu1 %v786_v38  ;;  %v1663_v43 = vadd.f32 %v1041_v18, %v747_v37 }
 0x420   :  { %v1658_v40 = vadd.f32 %v1229_v39, %v1041_v18  ;;  %v750_v41 = vpop.f32.mrb[27].mxu1  ;;  %v791_v42 = vsel %vm780_vm0, %v1653_v36, -inf }
 0x421   :  { %v1665_v44 = vadd.f32 %v1041_v18, %v750_v41  ;;  %v789_v54 = vsel %vm780_vm0, %v1663_v43, -inf }
 0x422   :  { %817 = vmax.xlane.f32.xlu0 %v791_v42  ;;  %v792_v45 = vsel %vm780_vm0, %v1658_v40, -inf }
 0x423   :  { %819 = vmax.xlane.f32.xlu1 %v792_v45  ;;  %v790_v57 = vsel %vm780_vm0, %v1665_v44, -inf }
 0x425   :  { %v1232_v46 = vpop.f32.mrb[28].mxu1 }
 0x426   :  { %v763_v55 = vpop.f32.mrb[29].mxu1  ;;  %813 = vmax.xlane.f32.xlu0 %v789_v54  ;;  %v1678_v61 = vadd.f32 %v1232_v46, %v1041_v18 }
 0x427   :  { %v1676_v58 = vadd.f32 %v1041_v18, %v763_v55  ;;  %v1233_v59 = vpop.f32.mrb[30].mxu1  ;;  %815 = vmax.xlane.f32.xlu1 %v790_v57 }
 0x428   :  { %v766_v60 = vpop.f32.mrb[31].mxu1  ;;  %v1685_v0 = vadd.f32 %v1233_v59, %v1041_v18  ;;  %v795_v1 = vsel %vm780_vm0, %v1678_v61, -inf }
 0x429   :  { %v1680_v62 = vadd.f32 %v1041_v18, %v766_v60  ;;  %v793_v63 = vsel %vm780_vm0, %v1676_v58, -inf }
 0x42a   :  { %821 = vmax.xlane.f32.xlu0 %v793_v63  ;;  %v796_v2 = vsel %vm780_vm0, %v1685_v0, -inf }
 0x42b   :  { %v794_v56 = vsel %vm780_vm0, %v1680_v62, -inf }
 0x42c   :  { %823 = vmax.xlane.f32.xlu1 %v794_v56 }
 0x42e   :  { %825 = vmax.xlane.f32.xlu0 %v795_v1 }
 0x430   :  { %827 = vmax.xlane.f32.xlu1 %v796_v2 }
 0x49e   :  { %v802_v3 = vpop.xlane.xlu1 %801 }
 0x49f   :  { %v1697_v4 = vsub.f32 %v1616_v48, %v802_v3  ;;  %v798_v5 = vpop.xlane.xlu0 %797 }
 0x4a0   :  { %v1700_v6 = vsub.f32 %v1618_v50, %v798_v5 }
 0x4a1   :  { %v849_v7 = vmul.f32 1.442695, %v1697_v4 }
 0x4a2   :  { %v845_v8 = vmul.f32 1.442695, %v1700_v6  ;;  %v804_v9 = vpop.xlane.xlu1 %803 }
 0x4a3   :  { %1275 = vpow2.f32 %v849_v7  ;;  %v1705_v10 = vsub.f32 %v1620_v19, %v804_v9  ;;  %v800_v11 = vpop.xlane.xlu0 %799 }
 0x4a4   :  { %v1708_v12 = vsub.f32 %v1625_v20, %v800_v11  ;;  %1277 = vpow2.f32 %v845_v8 }
 0x4a5   :  { %v851_v13 = vmul.f32 1.442695, %v1705_v10 }
 0x4a6   :  { %v847_v14 = vmul.f32 1.442695, %v1708_v12 }
 0x4a7   :  { %1279 = vpow2.f32 %v851_v13  ;;  %v810_v15 = vpop.xlane.xlu0 %809 }
 0x4a8   :  { %v1713_v16 = vsub.f32 %v1636_v25, %v810_v15  ;;  %v812_v18 = vpop.xlane.xlu1 %811  ;;  %1281 = vpow2.f32 %v847_v14 }
 0x4a9   :  { %v1716_v47 = vsub.f32 %v1638_v28, %v812_v18 }
 0x4aa   :  { %v857_v48 = vmul.f32 1.442695, %v1713_v16 }
 0x4ab   :  { %v859_v49 = vmul.f32 1.442695, %v1716_v47  ;;  %v806_v50 = vpop.xlane.xlu0 %805 }
 0x4ac   :  { %1283 = vpow2.f32 %v857_v48  ;;  %v1721_v51 = vsub.f32 %v1643_v31, %v806_v50  ;;  %v808_v19 = vpop.xlane.xlu1 %807 }
 0x4ad   :  { %v1276_v52 = vpop.eup %1275  ;;  %1285 = vpow2.f32 %v859_v49  ;;  %v1724_v53 = vsub.f32 %v1645_v32, %v808_v19 }
 0x4ae   :  { %v853_v20 = vmul.f32 1.442695, %v1721_v51  ;;  %v879_v21 = vsel %vm780_vm0, %v1276_v52, 0.0  ;;  %v1278_v22 = vpop.eup %1277 }
 0x4af   :  { %v855_v23 = vmul.f32 1.442695, %v1724_v53  ;;  %897 = vadd.xlane.f32.xlu0 %v879_v21  ;;  %v818_v24 = vpop.xlane.xlu0 %817  ;;  %v877_v31 = vsel %vm780_vm0, %v1278_v22, 0.0 }
 0x4b0   :  { %1287 = vpow2.f32 %v853_v20  ;;  %v1731_v25 = vsub.f32 %v1653_v36, %v818_v24  ;;  %v820_v26 = vpop.xlane.xlu1 %819 }
 0x4b1   :  { %v1280_v27 = vpop.eup %1279  ;;  %1289 = vpow2.f32 %v855_v23  ;;  %v1734_v28 = vsub.f32 %v1658_v40, %v820_v26 }
 0x4b2   :  { %v865_v29 = vmul.f32 1.442695, %v1731_v25  ;;  %v880_v30 = vsel %vm780_vm0, %v1280_v27, 0.0  ;;  %v1282_v32 = vpop.eup %1281 }
 0x4b3   :  { %v867_v33 = vmul.f32 1.442695, %v1734_v28  ;;  %899 = vadd.xlane.f32.xlu1 %v880_v30  ;;  %893 = vadd.xlane.f32.xlu0 %v877_v31  ;;  %v814_v34 = vpop.xlane.xlu0 %813  ;;  %v878_v40 = vsel %vm780_vm0, %v1282_v32, 0.0 }
 0x4b4   :  { %1291 = vpow2.f32 %v865_v29  ;;  %v1743_v35 = vsub.f32 %v1663_v43, %v814_v34  ;;  %v816_v36 = vpop.xlane.xlu1 %815 }
 0x4b5   :  { %1293 = vpow2.f32 %v867_v33  ;;  %v1746_v37 = vsub.f32 %v1665_v44, %v816_v36 }
 0x4b6   :  { %v1284_v38 = vpop.eup %1283  ;;  %v861_v39 = vmul.f32 1.442695, %v1743_v35 }
 0x4b7   :  { %v1286_v41 = vpop.eup %1285  ;;  %v863_v42 = vmul.f32 1.442695, %v1746_v37  ;;  %895 = vadd.xlane.f32.xlu1 %v878_v40  ;;  %v822_v45 = vpop.xlane.xlu0 %821  ;;  %v883_v43 = vsel %vm780_vm0, %v1284_v38, 0.0 }
 0x4b8   :  { %1295 = vpow2.f32 %v861_v39  ;;  %v1755_v46 = vsub.f32 %v1676_v58, %v822_v45  ;;  %905 = vadd.xlane.f32.xlu0 %v883_v43  ;;  %v884_v59 = vsel %vm780_vm0, %v1286_v41, 0.0 }
 0x4b9   :  { %1297 = vpow2.f32 %v863_v42  ;;  %v824_v44 = vpop.xlane.xlu1 %823 }
 0x4ba   :  { %v1288_v54 = vpop.eup %1287  ;;  %v869_v55 = vmul.f32 1.442695, %v1755_v46  ;;  %v1759_v57 = vsub.f32 %v1680_v62, %v824_v44 }
 0x4bb   :  { %v1290_v60 = vpop.eup %1289  ;;  %907 = vadd.xlane.f32.xlu1 %v884_v59  ;;  %v826_v63 = vpop.xlane.xlu0 %825  ;;  %v881_v56 = vsel %vm780_vm0, %v1288_v54, 0.0 }
 0x4bc   :  { %1299 = vpow2.f32 %v869_v55  ;;  %v871_v58 = vmul.f32 1.442695, %v1759_v57  ;;  %v1767_v1 = vsub.f32 %v1678_v61, %v826_v63  ;;  %901 = vadd.xlane.f32.xlu0 %v881_v56  ;;  %v882_v7 = vsel %vm780_vm0, %v1290_v60, 0.0 }
 0x4bd   :  { %v828_v2 = vpop.xlane.xlu1 %827 }
 0x4be   :  { %v1292_v3 = vpop.eup %1291  ;;  %1301 = vpow2.f32 %v871_v58  ;;  %v873_v62 = vmul.f32 1.442695, %v1767_v1  ;;  %v1771_v5 = vsub.f32 %v1685_v0, %v828_v2 }
 0x4bf   :  { %v1294_v8 = vpop.eup %1293  ;;  %903 = vadd.xlane.f32.xlu1 %v882_v7  ;;  %v887_v9 = vsel %vm780_vm0, %v1292_v3, 0.0 }
 0x4c0   :  { %1303 = vpow2.f32 %v873_v62  ;;  %v875_v61 = vmul.f32 1.442695, %v1771_v5  ;;  %913 = vadd.xlane.f32.xlu0 %v887_v9  ;;  %v888_v13 = vsel %vm780_vm0, %v1294_v8, 0.0 }
 0x4c2   :  { %v1296_v11 = vpop.eup %1295  ;;  %1305 = vpow2.f32 %v875_v61 }
 0x4c3   :  { %v1298_v14 = vpop.eup %1297  ;;  %915 = vadd.xlane.f32.xlu1 %v888_v13  ;;  %v885_v0 = vsel %vm780_vm0, %v1296_v11, 0.0 }
 0x4c4   :  { %909 = vadd.xlane.f32.xlu0 %v885_v0  ;;  %v886_v18 = vsel %vm780_vm0, %v1298_v14, 0.0 }
 0x4c6   :  { %v1300_v15 = vpop.eup %1299 }
 0x4c7   :  { %911 = vadd.xlane.f32.xlu1 %v886_v18  ;;  %v889_v48 = vsel %vm780_vm0, %v1300_v15, 0.0 }
 0x4c8   :  { %v1302_v49 = vpop.eup %1301  ;;  %917 = vadd.xlane.f32.xlu0 %v889_v48 }
 0x4c9   :  { %v890_v50 = vsel %vm780_vm0, %v1302_v49, 0.0 }
 0x4ca   :  { %v1304_v19 = vpop.eup %1303 }
 0x4cb   :  { %919 = vadd.xlane.f32.xlu1 %v890_v50  ;;  %v891_v52 = vsel %vm780_vm0, %v1304_v19, 0.0 }
 0x4cc   :  { %v1306_v20 = vpop.eup %1305  ;;  %921 = vadd.xlane.f32.xlu0 %v891_v52 }
 0x4cd   :  { %v892_v21 = vsel %vm780_vm0, %v1306_v20, 0.0 }
 0x4cf   :  { %923 = vadd.xlane.f32.xlu1 %v892_v21 }
 0x53c   :  { %v898_v22 = vpop.xlane.xlu0 %897 }
 0x53d   :  { %1307 = vlog2.f32 %v898_v22 }
 0x540   :  { %v900_v23 = vpop.xlane.xlu1 %899  ;;  %v894_v24 = vpop.xlane.xlu0 %893 }
 0x541   :  { %1309 = vlog2.f32 %v900_v23 }
 0x542   :  { %1311 = vlog2.f32 %v894_v24 }
 0x544   :  { %v896_v26 = vpop.xlane.xlu1 %895 }
 0x545   :  { %1313 = vlog2.f32 %v896_v26  ;;  %v906_v27 = vpop.xlane.xlu0 %905 }
 0x546   :  { %1315 = vlog2.f32 %v906_v27 }
 0x547   :  { %v1308_v29 = vpop.eup %1307 }
 0x548   :  { %v930_v30 = vmul.f32 0.6931472, %v1308_v29  ;;  %v908_v31 = vpop.xlane.xlu1 %907 }
 0x549   :  { %1317 = vlog2.f32 %v908_v31  ;;  %v902_v32 = vpop.xlane.xlu0 %901 }
 0x54a   :  { %v959_v33 = vsub.f32 %v1697_v4, %v930_v30  ;;  %1319 = vlog2.f32 %v902_v32 }
 0x54b   :  { %v1310_v17 = vpop.eup %1309 }
 0x54c   :  { %v1312_v34 = vpop.eup %1311  ;;  %975 = vst [vmem:[#allocation10 + $0x10] sm:$0xff] %v959_v33  ;;  %v932_v36 = vmul.f32 0.6931472, %v1310_v17  ;;  %v904_v38 = vpop.xlane.xlu1 %903 }
 0x54d   :  { %v926_v39 = vmul.f32 0.6931472, %v1312_v34  ;;  %1321 = vlog2.f32 %v904_v38  ;;  %v914_v40 = vpop.xlane.xlu0 %913 }
 0x54e   :  { %v960_v41 = vsub.f32 %v1705_v10, %v932_v36  ;;  %1323 = vlog2.f32 %v914_v40 }
 0x54f   :  { %v1314_v42 = vpop.eup %1313  ;;  %v957_v45 = vsub.f32 %v1700_v6, %v926_v39 }
 0x550   :  { %v1316_v43 = vpop.eup %1315  ;;  %976 = vst [vmem:[#allocation10 + $0x18] sm:$0xff] %v960_v41  ;;  %v928_v44 = vmul.f32 0.6931472, %v1314_v42  ;;  %v916_v54 = vpop.xlane.xlu1 %915 }
 0x551   :  { %973 = vst [vmem:[#allocation10] sm:$0xff] %v957_v45  ;;  %v938_v4 = vmul.f32 0.6931472, %v1316_v43  ;;  %1325 = vlog2.f32 %v916_v54  ;;  %v910_v55 = vpop.xlane.xlu0 %909 }
 0x552   :  { %v958_v59 = vsub.f32 %v1708_v12, %v928_v44  ;;  %1327 = vlog2.f32 %v910_v55 }
 0x553   :  { %v1318_v60 = vpop.eup %1317  ;;  %v963_v63 = vsub.f32 %v1713_v16, %v938_v4 }
 0x554   :  { %v1320_v56 = vpop.eup %1319  ;;  %974 = vst [vmem:[#allocation10 + $0x8] sm:$0xff] %v958_v59  ;;  %v940_v10 = vmul.f32 0.6931472, %v1318_v60  ;;  %v912_v58 = vpop.xlane.xlu1 %911 }
 0x555   :  { %979 = vst [vmem:[#allocation10 + $0x30] sm:$0xff] %v963_v63  ;;  %v934_v6 = vmul.f32 0.6931472, %v1320_v56  ;;  %1329 = vlog2.f32 %v912_v58  ;;  %v918_v2 = vpop.xlane.xlu0 %917 }
 0x556   :  { %v964_v3 = vsub.f32 %v1716_v47, %v940_v10  ;;  %1331 = vlog2.f32 %v918_v2 }
 0x557   :  { %v1322_v62 = vpop.eup %1321  ;;  %v961_v7 = vsub.f32 %v1721_v51, %v934_v6 }
 0x558   :  { %v1324_v8 = vpop.eup %1323  ;;  %980 = vst [vmem:[#allocation10 + $0x38] sm:$0xff] %v964_v3  ;;  %v936_v12 = vmul.f32 0.6931472, %v1322_v62  ;;  %v920_v9 = vpop.xlane.xlu1 %919 }
 0x559   :  { %977 = vst [vmem:[#allocation10 + $0x20] sm:$0xff] %v961_v7  ;;  %v946_v16 = vmul.f32 0.6931472, %v1324_v8  ;;  %1333 = vlog2.f32 %v920_v9  ;;  %v922_v61 = vpop.xlane.xlu0 %921 }
 0x55a   :  { %v962_v11 = vsub.f32 %v1724_v53, %v936_v12  ;;  %1335 = vlog2.f32 %v922_v61 }
 0x55b   :  { %v1326_v13 = vpop.eup %1325  ;;  %v967_v14 = vsub.f32 %v1731_v25, %v946_v16 }
 0x55c   :  { %v1328_v0 = vpop.eup %1327  ;;  %978 = vst [vmem:[#allocation10 + $0x28] sm:$0xff] %v962_v11  ;;  %v948_v47 = vmul.f32 0.6931472, %v1326_v13  ;;  %v924_v15 = vpop.xlane.xlu1 %923 }
 0x55d   :  { %983 = vst [vmem:[#allocation10 + $0x50] sm:$0xff] %v967_v14  ;;  %v942_v51 = vmul.f32 0.6931472, %v1328_v0  ;;  %1337 = vlog2.f32 %v924_v15 }
 0x55e   :  { %v968_v18 = vsub.f32 %v1734_v28, %v948_v47 }
 0x55f   :  { %v1330_v48 = vpop.eup %1329  ;;  %v965_v49 = vsub.f32 %v1743_v35, %v942_v51 }
 0x560   :  { %v1332_v50 = vpop.eup %1331  ;;  %984 = vst [vmem:[#allocation10 + $0x58] sm:$0xff] %v968_v18  ;;  %v944_v19 = vmul.f32 0.6931472, %v1330_v48 }
 0x561   :  { %981 = vst [vmem:[#allocation10 + $0x40] sm:$0xff] %v965_v49  ;;  %v950_v53 = vmul.f32 0.6931472, %v1332_v50 }
 0x562   :  { %v966_v52 = vsub.f32 %v1746_v37, %v944_v19 }
 0x563   :  { %v1334_v25 = vpop.eup %1333  ;;  %v969_v20 = vsub.f32 %v1755_v46, %v950_v53 }
 0x564   :  { %v1336_v21 = vpop.eup %1335  ;;  %982 = vst [vmem:[#allocation10 + $0x48] sm:$0xff] %v966_v52  ;;  %v952_v22 = vmul.f32 0.6931472, %v1334_v25 }
 0x565   :  { %985 = vst [vmem:[#allocation10 + $0x60] sm:$0xff] %v969_v20  ;;  %v954_v23 = vmul.f32 0.6931472, %v1336_v21 }
 0x566   :  { %v970_v28 = vsub.f32 %v1759_v57, %v952_v22 }
 0x567   :  { %v1338_v24 = vpop.eup %1337  ;;  %v971_v35 = vsub.f32 %v1767_v1, %v954_v23 }
 0x568   :  { %986 = vst [vmem:[#allocation10 + $0x68] sm:$0xff] %v970_v28  ;;  %v956_v26 = vmul.f32 0.6931472, %v1338_v24 }
 0x569   :  { %987 = vst [vmem:[#allocation10 + $0x70] sm:$0xff] %v971_v35 }
 0x56a   :  { %v972_v37 = vsub.f32 %v1771_v5, %v956_v26 }
 0x56c   :  { %988 = vst [vmem:[#allocation10 + $0x78] sm:$0xff] %v972_v37 }
 0x56d   :  { %1438 = shalt.err (!%p1435_p8)
}
 0x56e   :  { %s1439_s26 = scalar_lea.hbm %s1826_s6, 2048 }
 0x56f   :  { %p1440_p9 = scmp.ne.s32.totalorder %s1826_s6, %s1439_s26  ;;  %p1443_p10 = scmp.lt.u32.totalorder %s1439_s26, %s1826_s6 }
 0x571   :  { %p1445_p11 = pnand %p1443_p10, %p1440_p9 }
 0x573   :  { %1448 = shalt.err (!%p1445_p11)
}
 0x574   :  { %s1464_s7 = smov 128   ;;  %s1465_s8 = smov 8  }
 0x575   :  { %1000 = dma.vmem_to_hbm [thread:$0]  %s995_s21, 2048, %s1826_s6, [#allocation4], %s1464_s7, %s1464_s7, %s1465_s8  }
 0x576   :  { %1455 = dma.done.wait [#allocation4], 2048  }
 0x577   :  { %1456 = vsyncadd [#allocation4], 4294965248 }
 0x578   :  { %1004 = vsyncpa [#allocation3], 1 }
 0x579   :  { %1005 = vsyncpa [#allocation6], 1 }
 0x57a   :  { %1006 = vsyncpa [#allocation9], 1 }
 0x57b   :  { %1007 = vsyncpa [#allocation4], 1 }

</bundles_post_ra>
